<compile_context>
chip_gen: v7x
topology: tpu7x:2x2x1
jax: 0.10.0
libtpu: 0.0.40
codegen_flags: <defaults>
</compile_context>

<pallas_src>
import functools

import jax
import jax.numpy as jnp
from jax import lax
from jax.experimental import pallas as pl

C_PAD = 128  # lane-dense channel padding (multiple of 128)


# ----------------------------------------------------------------------------
# Fused Pallas kernel: all SAGEConv layers + relu + log_softmax
# ----------------------------------------------------------------------------
def fused_sage_kernel(a_ref, x_ref, w_ref, b_ref, o_ref, *, num_layers, valid_out):
    a = a_ref[...]                                       # [N, N]       bf16
    x = x_ref[...]                                       # [N, C_PAD]   f32
    for i in range(num_layers):                          # static unroll (small L)
        w = w_ref[i]                                     # [C_PAD, 2*C_PAD] bf16 = [W_l | W_r]
        h = jnp.dot(x.astype(jnp.bfloat16), w,
                    preferred_element_type=jnp.float32)  # [N, 2*C_PAD] f32   (MXU)
        h_l = h[:, :C_PAD]                               # x @ W_l
        h_r = h[:, C_PAD:]                               # x @ W_r
        agg = jnp.dot(a, h_l.astype(jnp.bfloat16),
                      preferred_element_type=jnp.float32)  # A_norm @ (x @ W_l)  (MXU)
        x = agg + h_r + b_ref[i]                         # f32 epilogue (VPU)
        if i != num_layers - 1:
            x = jnp.maximum(x, 0.0)                      # relu; eval-mode dropout == identity

    # Numerically stable log_softmax over the real (unpadded) classes only.
    col = lax.broadcasted_iota(jnp.int32, x.shape, 1)
    x = jnp.where(col < valid_out, x, -1e30)             # kill padded columns
    m = jnp.max(x, axis=-1, keepdims=True)
    s = x - m
    lse = jnp.log(jnp.sum(jnp.exp(s), axis=-1, keepdims=True))
    o_ref[...] = (s - lse).astype(o_ref.dtype)


# ----------------------------------------------------------------------------
# Glue: parameters, adjacency, packing, wrapper
# ----------------------------------------------------------------------------
def init_sage_params(key, in_channels, hidden_channels, out_channels, num_layers):
    """Deterministic Glorot-style init. W stored as [C_in, C_out] (x @ W)."""
    dims = [in_channels] + [hidden_channels] * (num_layers - 1) + [out_channels]
    params = []
    for i in range(num_layers):
        c_in, c_out = dims[i], dims[i + 1]
        key, k1, k2 = jax.random.split(key, 3)
        scale = jnp.sqrt(6.0 / (c_in + c_out))
        w_l = jax.random.uniform(k1, (c_in, c_out), jnp.float32, -scale, scale)
        w_r = jax.random.uniform(k2, (c_in, c_out), jnp.float32, -scale, scale)
        b = jnp.zeros((c_out,), jnp.float32)   # PyG: lin_l has bias, lin_r does not
        params.append((w_l, w_r, b))
    return params


def build_mean_adjacency(edge_index, num_nodes):
    """Dense row-normalized adjacency: A[dst, src] = 1/deg_in(dst)."""
    src, dst = edge_index[0], edge_index[1]
    a = jnp.zeros((num_nodes, num_nodes), jnp.float32).at[dst, src].add(1.0)
    deg = jnp.sum(a, axis=1, keepdims=True)
    return a / jnp.maximum(deg, 1.0)


def pack_params(params):
    """Zero-pad channels to C_PAD and pack [W_l | W_r] per layer; stack across layers."""
    w_all, b_all = [], []
    for (w_l, w_r, b) in params:
        c_in, c_out = w_l.shape
        wp = jnp.zeros((C_PAD, 2 * C_PAD), jnp.float32)
        wp = wp.at[:c_in, :c_out].set(w_l)
        wp = wp.at[:c_in, C_PAD:C_PAD + c_out].set(w_r)
        bp = jnp.zeros((1, C_PAD), jnp.float32).at[0, :c_out].set(b)
        w_all.append(wp)
        b_all.append(bp)
    return (jnp.stack(w_all).astype(jnp.bfloat16),   # [L, C_PAD, 2*C_PAD] bf16
            jnp.stack(b_all))                        # [L, 1, C_PAD]       f32


def sage_forward(x, edge_index, params, out_channels):
    n, c_in = x.shape
    num_layers = len(params)
    a_bf = build_mean_adjacency(edge_index, n).astype(jnp.bfloat16)
    x_pad = jnp.zeros((n, C_PAD), jnp.float32).at[:, :c_in].set(x)
    w_all, b_all = pack_params(params)

    out_pad = pl.pallas_call(
        functools.partial(fused_sage_kernel,
                          num_layers=num_layers, valid_out=out_channels),
        out_shape=jax.ShapeDtypeStruct((n, C_PAD), jnp.float32),
        in_specs=[
            pl.BlockSpec((n, n), lambda: (0, 0)),
            pl.BlockSpec((n, C_PAD), lambda: (0, 0)),
            pl.BlockSpec((num_layers, C_PAD, 2 * C_PAD), lambda: (0, 0, 0)),
            pl.BlockSpec((num_layers, 1, C_PAD), lambda: (0, 0, 0)),
        ],
        out_specs=pl.BlockSpec((n, C_PAD), lambda: (0, 0)),
    )(a_bf, x_pad, w_all, b_all)
    return out_pad[:, :out_channels]


def sage_forward_ref(x, edge_index, params):
    """Plain-JAX f32 reference of the module's eval-mode forward (no padding / bf16)."""
    a = build_mean_adjacency(edge_index, x.shape[0])
    num_layers = len(params)
    for i, (w_l, w_r, b) in enumerate(params):
        x = a @ x @ w_l + x @ w_r + b
        if i != num_layers - 1:
            x = jax.nn.relu(x)
    return jax.nn.log_softmax(x, axis=-1)


# ----------------------------------------------------------------------------
# Main
# ----------------------------------------------------------------------------
if __name__ == "__main__":
    key = jax.random.PRNGKey(0)
    k_x, k_e, k_p = jax.random.split(key, 3)

    num_nodes, num_edges = 64, 256
    in_channels, hidden_channels, out_channels, num_layers = 16, 32, 8, 3

    x = jax.random.normal(k_x, (num_nodes, in_channels), jnp.float32)
    edge_index = jax.random.randint(k_e, (2, num_edges), 0, num_nodes, jnp.int32)
    params = init_sage_params(k_p, in_channels, hidden_channels, out_channels, num_layers)

    out = sage_forward(x, edge_index, params, out_channels)
    out = jax.block_until_ready(out)

    assert out.shape == (num_nodes, out_channels)
    assert bool(jnp.all(jnp.isfinite(out)))
    # log_softmax rows should sum (in prob space) to ~1
    assert bool(jnp.allclose(jnp.sum(jnp.exp(out), axis=-1), 1.0, atol=1e-4))

    # Compare against plain-JAX f32 reference (loose tol covers bf16 MXU operands).
    ref = sage_forward_ref(x, edge_index, params)
    assert bool(jnp.allclose(out, ref, atol=0.25)), float(jnp.max(jnp.abs(out - ref)))

    print("KERNEL_OK")
</pallas_src>

<mosaic_0001>
module attributes {stable_mosaic.version = 11 : i64} {
  func.func @fused_sage_kernel(%arg0: memref<64x64xbf16, #tpu.memory_space<vmem>>, %arg1: memref<64x128xf32, #tpu.memory_space<vmem>>, %arg2: memref<3x128x256xbf16, #tpu.memory_space<vmem>>, %arg3: memref<3x1x128xf32, #tpu.memory_space<vmem>>, %arg4: memref<64x128xf32, #tpu.memory_space<vmem>>) attributes {dimension_semantics = [], scalar_prefetch = 0 : i64, scratch_operands = 0 : i64, tpu.core_type = #tpu.core_type<tc>} {
    %c0 = arith.constant 0 : index
    %c0_0 = arith.constant 0 : index
    %0 = vector.load %arg0[%c0, %c0_0] : memref<64x64xbf16, #tpu.memory_space<vmem>>, vector<64x64xbf16>
    %c0_1 = arith.constant 0 : index
    %c0_2 = arith.constant 0 : index
    %1 = vector.load %arg1[%c0_1, %c0_2] : memref<64x128xf32, #tpu.memory_space<vmem>>, vector<64x128xf32>
    %c0_3 = arith.constant 0 : index
    %c0_4 = arith.constant 0 : index
    %c0_5 = arith.constant 0 : index
    %2 = vector.load %arg2[%c0_3, %c0_4, %c0_5] : memref<3x128x256xbf16, #tpu.memory_space<vmem>>, vector<1x128x256xbf16>
    %3 = vector.shape_cast %2 : vector<1x128x256xbf16> to vector<128x256xbf16>
    %4 = arith.truncf %1 : vector<64x128xf32> to vector<64x128xbf16>
    %cst = arith.constant dense<0.000000e+00> : vector<64x256xf32>
    %5 = tpu.matmul %4, %3, %cst {dimension_numbers = #tpu.dot_dimension_numbers<[1], [0], [0], [1], [0, 0, 1, 1], [], []>} : vector<64x128xbf16>, vector<128x256xbf16>, vector<64x256xf32> -> vector<64x256xf32>
    %6 = vector.extract_strided_slice %5 {offsets = [0, 0], sizes = [64, 128], strides = [1, 1]} : vector<64x256xf32> to vector<64x128xf32>
    %7 = vector.extract_strided_slice %5 {offsets = [0, 128], sizes = [64, 128], strides = [1, 1]} : vector<64x256xf32> to vector<64x128xf32>
    %8 = arith.truncf %6 : vector<64x128xf32> to vector<64x128xbf16>
    %cst_6 = arith.constant dense<0.000000e+00> : vector<64x128xf32>
    %9 = tpu.matmul %0, %8, %cst_6 {dimension_numbers = #tpu.dot_dimension_numbers<[1], [0], [0], [1], [0, 0, 1, 1], [], []>} : vector<64x64xbf16>, vector<64x128xbf16>, vector<64x128xf32> -> vector<64x128xf32>
    %10 = arith.addf %9, %7 : vector<64x128xf32>
    %c0_7 = arith.constant 0 : index
    %c0_8 = arith.constant 0 : index
    %c0_9 = arith.constant 0 : index
    %11 = vector.load %arg3[%c0_7, %c0_8, %c0_9] : memref<3x1x128xf32, #tpu.memory_space<vmem>>, vector<1x1x128xf32>
    %12 = vector.shape_cast %11 : vector<1x1x128xf32> to vector<1x128xf32>
    %13 = vector.broadcast %12 : vector<1x128xf32> to vector<64x128xf32>
    %14 = arith.addf %10, %13 : vector<64x128xf32>
    %cst_10 = arith.constant 0.000000e+00 : f32
    %15 = vector.broadcast %cst_10 : f32 to vector<64x128xf32>
    %16 = arith.maximumf %14, %15 : vector<64x128xf32>
    %c1 = arith.constant 1 : index
    %c0_11 = arith.constant 0 : index
    %c0_12 = arith.constant 0 : index
    %17 = vector.load %arg2[%c1, %c0_11, %c0_12] : memref<3x128x256xbf16, #tpu.memory_space<vmem>>, vector<1x128x256xbf16>
    %18 = vector.shape_cast %17 : vector<1x128x256xbf16> to vector<128x256xbf16>
    %19 = arith.truncf %16 : vector<64x128xf32> to vector<64x128xbf16>
    %cst_13 = arith.constant dense<0.000000e+00> : vector<64x256xf32>
    %20 = tpu.matmul %19, %18, %cst_13 {dimension_numbers = #tpu.dot_dimension_numbers<[1], [0], [0], [1], [0, 0, 1, 1], [], []>} : vector<64x128xbf16>, vector<128x256xbf16>, vector<64x256xf32> -> vector<64x256xf32>
    %21 = vector.extract_strided_slice %20 {offsets = [0, 0], sizes = [64, 128], strides = [1, 1]} : vector<64x256xf32> to vector<64x128xf32>
    %22 = vector.extract_strided_slice %20 {offsets = [0, 128], sizes = [64, 128], strides = [1, 1]} : vector<64x256xf32> to vector<64x128xf32>
    %23 = arith.truncf %21 : vector<64x128xf32> to vector<64x128xbf16>
    %cst_14 = arith.constant dense<0.000000e+00> : vector<64x128xf32>
    %24 = tpu.matmul %0, %23, %cst_14 {dimension_numbers = #tpu.dot_dimension_numbers<[1], [0], [0], [1], [0, 0, 1, 1], [], []>} : vector<64x64xbf16>, vector<64x128xbf16>, vector<64x128xf32> -> vector<64x128xf32>
    %25 = arith.addf %24, %22 : vector<64x128xf32>
    %c1_15 = arith.constant 1 : index
    %c0_16 = arith.constant 0 : index
    %c0_17 = arith.constant 0 : index
    %26 = vector.load %arg3[%c1_15, %c0_16, %c0_17] : memref<3x1x128xf32, #tpu.memory_space<vmem>>, vector<1x1x128xf32>
    %27 = vector.shape_cast %26 : vector<1x1x128xf32> to vector<1x128xf32>
    %28 = vector.broadcast %27 : vector<1x128xf32> to vector<64x128xf32>
    %29 = arith.addf %25, %28 : vector<64x128xf32>
    %cst_18 = arith.constant 0.000000e+00 : f32
    %30 = vector.broadcast %cst_18 : f32 to vector<64x128xf32>
    %31 = arith.maximumf %29, %30 : vector<64x128xf32>
    %c2 = arith.constant 2 : index
    %c0_19 = arith.constant 0 : index
    %c0_20 = arith.constant 0 : index
    %32 = vector.load %arg2[%c2, %c0_19, %c0_20] : memref<3x128x256xbf16, #tpu.memory_space<vmem>>, vector<1x128x256xbf16>
    %33 = vector.shape_cast %32 : vector<1x128x256xbf16> to vector<128x256xbf16>
    %34 = arith.truncf %31 : vector<64x128xf32> to vector<64x128xbf16>
    %cst_21 = arith.constant dense<0.000000e+00> : vector<64x256xf32>
    %35 = tpu.matmul %34, %33, %cst_21 {dimension_numbers = #tpu.dot_dimension_numbers<[1], [0], [0], [1], [0, 0, 1, 1], [], []>} : vector<64x128xbf16>, vector<128x256xbf16>, vector<64x256xf32> -> vector<64x256xf32>
    %36 = vector.extract_strided_slice %35 {offsets = [0, 0], sizes = [64, 128], strides = [1, 1]} : vector<64x256xf32> to vector<64x128xf32>
    %37 = vector.extract_strided_slice %35 {offsets = [0, 128], sizes = [64, 128], strides = [1, 1]} : vector<64x256xf32> to vector<64x128xf32>
    %38 = arith.truncf %36 : vector<64x128xf32> to vector<64x128xbf16>
    %cst_22 = arith.constant dense<0.000000e+00> : vector<64x128xf32>
    %39 = tpu.matmul %0, %38, %cst_22 {dimension_numbers = #tpu.dot_dimension_numbers<[1], [0], [0], [1], [0, 0, 1, 1], [], []>} : vector<64x64xbf16>, vector<64x128xbf16>, vector<64x128xf32> -> vector<64x128xf32>
    %40 = arith.addf %39, %37 : vector<64x128xf32>
    %c2_23 = arith.constant 2 : index
    %c0_24 = arith.constant 0 : index
    %c0_25 = arith.constant 0 : index
    %41 = vector.load %arg3[%c2_23, %c0_24, %c0_25] : memref<3x1x128xf32, #tpu.memory_space<vmem>>, vector<1x1x128xf32>
    %42 = vector.shape_cast %41 : vector<1x1x128xf32> to vector<1x128xf32>
    %43 = vector.broadcast %42 : vector<1x128xf32> to vector<64x128xf32>
    %44 = arith.addf %40, %43 : vector<64x128xf32>
    %45 = tpu.iota {dimensions = array<i32: 1>} : vector<64x128xi32>
    %c8_i32 = arith.constant 8 : i32
    %46 = vector.broadcast %c8_i32 : i32 to vector<64x128xi32>
    %47 = arith.cmpi slt, %45, %46 : vector<64x128xi32>
    %cst_26 = arith.constant -1.000000e+30 : f32
    %48 = vector.broadcast %cst_26 : f32 to vector<64x128xf32>
    %49 = arith.select %47, %44, %48 : vector<64x128xi1>, vector<64x128xf32>
    %cst_27 = arith.constant dense<0xFF800000> : vector<64xf32>
    %50 = vector.multi_reduction <maximumf>, %49, %cst_27 [1] : vector<64x128xf32> to vector<64xf32>
    %51 = vector.shape_cast %50 : vector<64xf32> to vector<64x1xf32>
    %52 = vector.broadcast %51 : vector<64x1xf32> to vector<64x128xf32>
    %53 = arith.subf %49, %52 : vector<64x128xf32>
    %54 = math.exp %53 : vector<64x128xf32>
    %cst_28 = arith.constant dense<0.000000e+00> : vector<64xf32>
    %55 = vector.multi_reduction <add>, %54, %cst_28 [1] : vector<64x128xf32> to vector<64xf32>
    %56 = vector.shape_cast %55 : vector<64xf32> to vector<64x1xf32>
    %57 = math.log %56 : vector<64x1xf32>
    %58 = vector.broadcast %57 : vector<64x1xf32> to vector<64x128xf32>
    %59 = arith.subf %53, %58 : vector<64x128xf32>
    %c0_29 = arith.constant 0 : index
    %c0_30 = arith.constant 0 : index
    %60 = vector.load %arg4[%c0_29, %c0_30] : memref<64x128xf32, #tpu.memory_space<vmem>>, vector<64x128xf32>
    tpu.vector_store %arg4[%c0_29, %c0_30], %59 {strides = array<i32>} : memref<64x128xf32, #tpu.memory_space<vmem>>, vector<64x128xf32>,
    return
  }
}

</mosaic_0001>

<bundles_post_ra>
// kernel: tpu_custom_call.1
= control target key start
LH: loop header
LB: loop body
LE: loop exit
PB: predicated region body
PF: predicated region fallthrough
CT: control target
= control target key end

     0   :  { %9 = vsyncpa [#allocation3], 0  ;;  %s1574_s0 = inlined_call_operand.hbm [shape: bf16[64,64], index: 0, kind: input, shape index: {}]   ;;  %s1575_s1 = inlined_call_operand.hbm [shape: f32[64,128], index: 1, kind: input, shape index: {}]   ;;  %s1576_s2 = inlined_call_operand.hbm [shape: bf16[3,128,256], index: 2, kind: input, shape index: {}]   ;;  %s1577_s3 = inlined_call_operand.vmem [shape: f32[3,1,128], index: 3, kind: input, shape index: {}]   ;;  %s1578_s4 = inlined_call_operand.hbm [shape: f32[64,128], index: 4, kind: output, shape index: {}]  }
   0x1   :  { %10 = vsyncpa [#allocation6], 0 }
   0x2   :  { %11 = vsyncpa [#allocation4], 0  ;;  %s1369_s15 = smov [#allocation5]   ;;  %s1275_s19 = scalar_lea.hbm %s1575_s1, 1024 }
   0x3   :  { %s29_s16 = sshll.u32 %s1369_s15, 4  ;;  %p1276_p0 = scmp.ne.s32.totalorder %s1575_s1, %s1275_s19  ;;  %s30_s16 = int_to_ptr.vmem [resolvable:$true] %s29_s16 }
   0x4   :  { %p1279_p1 = scmp.lt.u32.totalorder %s1275_s19, %s1575_s1 }
   0x6   :  { %p1281_p2 = pnand %p1279_p1, %p1276_p0 }
   0x8   :  { %1284 = shalt.err (!%p1281_p2)
}
   0x9   :  { %s1285_s24 = scalar_lea.vmem %s30_s16, 1024  ;;  %p1290_p4 = scmp.lt.s32.totalorder %s30_s16, %s30_s16 }
   0xa   :  { %p1286_p3 = scmp.ne.s32.totalorder %s30_s16, %s1285_s24  ;;  %p1291_p5 = scmp.lt.s32.totalorder %s1285_s24, %s1285_s24 }
   0xc   :  { %p1292_p6 = por %p1291_p5, %p1290_p4 }
   0xe   :  { %p1293_p7 = pnand %p1292_p6, %p1286_p3 }
  0x10   :  { %1296 = shalt.err (!%p1293_p7)
}
  0x11   :  { %s1370_s25 = smov 128   ;;  %s1371_s26 = smov 8  }
  0x12   :  { %35 = dma.hbm_to_vmem [thread:$0]  %s1575_s1, 1024, %s30_s16, [#allocation6], %s1370_s25, %s1370_s25, %s1371_s26  }
  0x13   :  { %s1372_s29 = smov [#allocation2]   ;;  %s1297_s7 = scalar_lea.hbm %s1574_s0, 512 }
  0x14   :  { %s17_s30 = sshll.u32 %s1372_s29, 4  ;;  %p1298_p8 = scmp.ne.s32.totalorder %s1574_s0, %s1297_s7  ;;  %s18_s30 = int_to_ptr.vmem [resolvable:$true] %s17_s30 }
  0x15   :  { %p1301_p9 = scmp.lt.u32.totalorder %s1297_s7, %s1574_s0 }
  0x17   :  { %p1303_p10 = pnand %p1301_p9, %p1298_p8 }
  0x19   :  { %1306 = shalt.err (!%p1303_p10)
}
  0x1a   :  { %s1307_s12 = scalar_lea.vmem %s18_s30, 512  ;;  %p1312_p12 = scmp.lt.s32.totalorder %s18_s30, %s18_s30 }
  0x1b   :  { %p1308_p11 = scmp.ne.s32.totalorder %s18_s30, %s1307_s12  ;;  %p1313_p13 = scmp.lt.s32.totalorder %s1307_s12, %s1307_s12 }
  0x1d   :  { %p1314_p0 = por %p1313_p13, %p1312_p12 }
  0x1f   :  { %p1315_p1 = pnand %p1314_p0, %p1308_p11 }
  0x21   :  { %1318 = shalt.err (!%p1315_p1)
}
  0x22   :  { %s1373_s1 = smov 64   ;;  %s1374_s13 = smov 4  }
  0x23   :  { %23 = dma.hbm_to_vmem [thread:$0]  %s1574_s0, 512, %s18_s30, [#allocation3], %s1373_s1, %s1373_s1, %s1374_s13  }
  0x24   :  { %s1375_s16 = smov [#allocation7]   ;;  %s1319_s20 = scalar_lea.hbm %s1576_s2, 6144 }
  0x25   :  { %s41_s17 = sshll.u32 %s1375_s16, 4  ;;  %p1320_p2 = scmp.ne.s32.totalorder %s1576_s2, %s1319_s20  ;;  %s42_s17 = int_to_ptr.vmem [resolvable:$true] %s41_s17 }
  0x26   :  { %p1323_p3 = scmp.lt.u32.totalorder %s1319_s20, %s1576_s2 }
  0x28   :  { %p1325_p4 = pnand %p1323_p3, %p1320_p2 }
  0x2a   :  { %1328 = shalt.err (!%p1325_p4)
}
  0x2b   :  { %s1329_s27 = scalar_lea.vmem %s42_s17, 6144  ;;  %p1334_p6 = scmp.lt.s32.totalorder %s42_s17, %s42_s17 }
  0x2c   :  { %p1330_p5 = scmp.ne.s32.totalorder %s42_s17, %s1329_s27  ;;  %p1335_p7 = scmp.lt.s32.totalorder %s1329_s27, %s1329_s27 }
  0x2e   :  { %p1336_p8 = por %p1335_p7, %p1334_p6 }
  0x30   :  { %p1337_p9 = pnand %p1336_p8, %p1330_p5 }
  0x32   :  { %1340 = shalt.err (!%p1337_p9)
}
  0x33   :  { %47 = dma.hbm_to_vmem [thread:$0]  %s1576_s2, 6144, %s42_s17, [#allocation6], %s1370_s25, %s1370_s25, %s1371_s26  }
  0x34   :  { %1363 = dma.done.wait [#allocation3], 512  }
  0x35   :  { %1364 = vsyncadd [#allocation3], 4294966784 }
  0x36   :  { %1365 = dma.done.wait [#allocation6], 7168  }
  0x37   :  { %1366 = vsyncadd [#allocation6], 4294960128  ;;  %v1376_v0 = vmov 0   ;;  %v1167_v1 = vld [vmem:[#allocation7 + $0x4] ss:$8 sps:$4 sm:$0xff]   ;;  %v70_v20 = vld [vmem:[#allocation5 + $0x10] sm:$0xff] }
  0x38   :  { %208 = vmatprep.mubr.bf16.mxu0 %v1376_v0  ;;  %v1169_v2 = vld [vmem:[#allocation7] ss:$8 sps:$4 sm:$0xff]   ;;  %176 = vmatprep.subr.bf16.mxu0 %v1167_v1  ;;  %v1170_v3 = vld [vmem:[#allocation7 + $0x14] ss:$8 sps:$4 sm:$0xff]   ;;  %v1172_v4 = vld [vmem:[#allocation7 + $0x10] ss:$8 sps:$4 sm:$0xff]  }
  0x39   :  { %177 = vmatpush1.bf16.msra.mxu0 %v1169_v2  ;;  %v1173_v5 = vld [vmem:[#allocation7 + $0x24] ss:$8 sps:$4 sm:$0xff]   ;;  %v1175_v6 = vld [vmem:[#allocation7 + $0x20] ss:$8 sps:$4 sm:$0xff]   ;;  %v1176_v7 = vld [vmem:[#allocation7 + $0x34] ss:$8 sps:$4 sm:$0xff]  }
  0x3a   :  { %178 = vmatprep.subr.bf16.mxu0 %v1170_v3  ;;  %v1178_v8 = vld [vmem:[#allocation7 + $0x30] ss:$8 sps:$4 sm:$0xff]   ;;  %v1179_v9 = vld [vmem:[#allocation7 + $0x44] ss:$8 sps:$4 sm:$0xff]   ;;  %v1181_v10 = vld [vmem:[#allocation7 + $0x40] ss:$8 sps:$4 sm:$0xff]  }
  0x3b   :  { %v1182_v11 = vld [vmem:[#allocation7 + $0x54] ss:$8 sps:$4 sm:$0xff]   ;;  %v1184_v12 = vld [vmem:[#allocation7 + $0x50] ss:$8 sps:$4 sm:$0xff]   ;;  %v1185_v13 = vld [vmem:[#allocation7 + $0x64] ss:$8 sps:$4 sm:$0xff]  }
  0x3c   :  { %v1187_v14 = vld [vmem:[#allocation7 + $0x60] ss:$8 sps:$4 sm:$0xff]   ;;  %v1188_v15 = vld [vmem:[#allocation7 + $0x74] ss:$8 sps:$4 sm:$0xff]   ;;  %v1190_v16 = vld [vmem:[#allocation7 + $0x70] ss:$8 sps:$4 sm:$0xff]  }
  0x3d   :  { %179 = vmatpush1.bf16.msra.mxu0 %v1172_v4  ;;  %v68_v17 = vld [vmem:[#allocation5] sm:$0xff]  ;;  %v69_v18 = vld [vmem:[#allocation5 + $0x8] sm:$0xff]  ;;  %v71_v21 = vld [vmem:[#allocation5 + $0x18] sm:$0xff]  ;;  %vm273_vm0 = vcmask 523264  }
  0x3e   :  { %180 = vmatprep.subr.bf16.mxu0 %v1173_v5  ;;  %v92_v19 = vpack.c.bf16 %v69_v18, %v68_v17  ;;  %v93_v22 = vpack.c.bf16 %v71_v21, %v70_v20  ;;  %v72_v23 = vld [vmem:[#allocation5 + $0x20] sm:$0xff]  ;;  %v73_v24 = vld [vmem:[#allocation5 + $0x28] sm:$0xff]  ;;  %v74_v26 = vld [vmem:[#allocation5 + $0x30] sm:$0xff] }
  0x3f   :  { %v94_v25 = vpack.c.bf16 %v73_v24, %v72_v23  ;;  %v75_v27 = vld [vmem:[#allocation5 + $0x38] sm:$0xff]  ;;  %v1449_v29 = vld [vmem:[#allocation2] sm:$0xff]   ;;  %v1469_v51 = vld [vmem:[#allocation2 + $0x8] sm:$0xff]  }
  0x40   :  { %v95_v28 = vpack.c.bf16 %v75_v27, %v74_v26  ;;  %1118 = vmatprep.mubr.msk.bf16.mxu1 %vm273_vm0, %v1449_v29  ;;  %v1197_v50 = vld [vmem:[#allocation7 + $0x84] ss:$8 sps:$4 sm:$0xff]   ;;  %v1471_v52 = vld [vmem:[#allocation2 + $0x10] sm:$0xff]   ;;  %v1195_v53 = vld [vmem:[#allocation7 + $0x80] ss:$8 sps:$4 sm:$0xff]  }
  0x41   :  { %181 = vmatpush1.bf16.msra.mxu0 %v1175_v6  ;;  %v1200_v54 = vld [vmem:[#allocation7 + $0x94] ss:$8 sps:$4 sm:$0xff]   ;;  %v1198_v55 = vld [vmem:[#allocation7 + $0x90] ss:$8 sps:$4 sm:$0xff]   ;;  %v1203_v56 = vld [vmem:[#allocation7 + $0xa4] ss:$8 sps:$4 sm:$0xff]  }
  0x42   :  { %182 = vmatprep.subr.bf16.mxu0 %v1176_v7  ;;  %v1477_v57 = vld [vmem:[#allocation2 + $0x18] sm:$0xff]   ;;  %v1201_v58 = vld [vmem:[#allocation7 + $0xa0] ss:$8 sps:$4 sm:$0xff]   ;;  %v1209_v61 = vld [vmem:[#allocation7 + $0xc4] ss:$8 sps:$4 sm:$0xff]  }
  0x43   :  { %v1206_v59 = vld [vmem:[#allocation7 + $0xb4] ss:$8 sps:$4 sm:$0xff]   ;;  %v1204_v60 = vld [vmem:[#allocation7 + $0xb0] ss:$8 sps:$4 sm:$0xff]   ;;  %v1207_v62 = vld [vmem:[#allocation7 + $0xc0] ss:$8 sps:$4 sm:$0xff]  }
  0x44   :  { %v1212_v63 = vld [vmem:[#allocation7 + $0xd4] ss:$8 sps:$4 sm:$0xff]   ;;  %v1210_v1 = vld [vmem:[#allocation7 + $0xd0] ss:$8 sps:$4 sm:$0xff]   ;;  %v1215_v2 = vld [vmem:[#allocation7 + $0xe4] ss:$8 sps:$4 sm:$0xff]  }
  0x45   :  { %183 = vmatpush1.bf16.msra.mxu0 %v1178_v8  ;;  %v1213_v3 = vld [vmem:[#allocation7 + $0xe0] ss:$8 sps:$4 sm:$0xff]   ;;  %v1218_v4 = vld [vmem:[#allocation7 + $0xf4] ss:$8 sps:$4 sm:$0xff]   ;;  %v1216_v5 = vld [vmem:[#allocation7 + $0xf0] ss:$8 sps:$4 sm:$0xff]  }
  0x46   :  { %184 = vmatprep.subr.bf16.mxu0 %v1179_v9  ;;  %v1041_v7 = vld [vmem:[%s1577_s3] ss:$0 sm:$0xff] }
  0x49   :  { %185 = vmatpush1.bf16.msra.mxu0 %v1181_v10 }
  0x4a   :  { %186 = vmatprep.subr.bf16.mxu0 %v1182_v11 }
  0x4d   :  { %187 = vmatpush1.bf16.msra.mxu0 %v1184_v12 }
  0x4e   :  { %188 = vmatprep.subr.bf16.mxu0 %v1185_v13 }
  0x51   :  { %189 = vmatpush1.bf16.msra.mxu0 %v1187_v14 }
  0x52   :  { %190 = vmatprep.subr.bf16.mxu0 %v1188_v15 }
  0x55   :  { %191 = vmatpush1.bf16.msra.mxu0 %v1190_v16 }
  0x58   :  { %209 = vmatmul.mubr.bf16.vlgmr.msra.gmra.mrb[0].mxu0 %v92_v19 }
  0x59   :  { %218 = vmatprep.mubr.bf16.mxu0 %v1376_v0 }
  0x60   :  { %219 = vmatmul.mubr.bf16.gmra.mrb[4].mxu0 %v93_v22 }
  0x61   :  { %228 = vmatprep.mubr.bf16.mxu0 %v1376_v0 }
  0x68   :  { %229 = vmatmul.mubr.bf16.gmra.mrb[8].mxu0 %v94_v25 }
  0x69   :  { %238 = vmatprep.mubr.bf16.mxu0 %v1376_v0 }
  0x70   :  { %239 = vmatmul.mubr.bf16.gmra.mrb[12].mxu0 %v95_v28 }
  0x71   :  { %1134 = vmatprep.mubr.msk.bf16.mxu0 %vm273_vm0, %v1449_v29 }
 0x12b   :  { %v210_v30 = vpop.f32.mrb[0].mxu0 }
 0x12c   :  { %v1455_v31 = vpop.f32.mrb[1].mxu0 }
 0x12d   :  { %v214_v32 = vpop.f32.mrb[2].mxu0 }
 0x12e   :  { %v249_v33 = vpack.c.bf16 %v214_v32, %v210_v30  ;;  %v1457_v34 = vpop.f32.mrb[3].mxu0 }
 0x130   :  { %1110 = vmatprep.subr.bf16.mxu1 %v249_v33 }
 0x131   :  { %1111 = vmatpush3.bf16.msra.mxu1 %v249_v33 }
 0x133   :  { %v220_v35 = vpop.f32.mrb[4].mxu0 }
 0x134   :  { %v222_v36 = vpop.f32.mrb[5].mxu0 }
 0x135   :  { %v224_v37 = vpop.f32.mrb[6].mxu0 }
 0x136   :  { %v250_v38 = vpack.c.bf16 %v224_v37, %v220_v35  ;;  %v1459_v39 = vpop.f32.mrb[7].mxu0 }
 0x138   :  { %1112 = vmatprep.subr.bf16.mxu1 %v250_v38 }
 0x139   :  { %1113 = vmatpush3.bf16.msra.mxu1 %v250_v38 }
 0x13b   :  { %v230_v40 = vpop.f32.mrb[8].mxu0 }
 0x13c   :  { %v1461_v41 = vpop.f32.mrb[9].mxu0 }
 0x13d   :  { %v234_v42 = vpop.f32.mrb[10].mxu0 }
 0x13e   :  { %v251_v43 = vpack.c.bf16 %v234_v42, %v230_v40  ;;  %v1463_v44 = vpop.f32.mrb[11].mxu0 }
 0x140   :  { %1114 = vmatprep.subr.bf16.mxu1 %v251_v43 }
 0x141   :  { %1115 = vmatpush3.bf16.msra.mxu1 %v251_v43 }
 0x143   :  { %v240_v45 = vpop.f32.mrb[12].mxu0 }
 0x144   :  { %v1465_v46 = vpop.f32.mrb[13].mxu0 }
 0x145   :  { %v244_v47 = vpop.f32.mrb[14].mxu0 }
 0x146   :  { %v252_v48 = vpack.c.bf16 %v244_v47, %v240_v45  ;;  %v1467_v49 = vpop.f32.mrb[15].mxu0  ;;  %v1222_v47 = vld [vmem:[#allocation7 + $0x110] ss:$8 sps:$4 sm:$0xff]  }
 0x148   :  { %1116 = vmatprep.subr.bf16.mxu1 %v252_v48 }
 0x149   :  { %1117 = vmatpush3.bf16.msra.mxu1 %v252_v48  ;;  %v1227_v48 = vld [vmem:[#allocation7 + $0x124] ss:$8 sps:$4 sm:$0xff]  }
 0x14a   :  { %475 = vmatprep.subr.bf16.mxu1 %v1197_v50  ;;  %v1230_v50 = vld [vmem:[#allocation7 + $0x134] ss:$8 sps:$4 sm:$0xff]  }
 0x14c   :  { %1119 = vmatmul.mubr.msk.bf16.vlgmr.msra.gmra.mrb[0].mxu1 %vm273_vm0, %v1469_v51 }
 0x14d   :  { %1122 = vmatprep.mubr.msk.bf16.mxu1 %vm273_vm0, %v1471_v52  ;;  %476 = vmatpush1.bf16.msra.mxu1 %v1195_v53  ;;  %v1228_v53 = vld [vmem:[#allocation7 + $0x130] ss:$8 sps:$4 sm:$0xff]  }
 0x14e   :  { %477 = vmatprep.subr.bf16.mxu1 %v1200_v54  ;;  %v1233_v54 = vld [vmem:[#allocation7 + $0x144] ss:$8 sps:$4 sm:$0xff]  }
 0x151   :  { %478 = vmatpush1.bf16.msra.mxu1 %v1198_v55  ;;  %v1231_v55 = vld [vmem:[#allocation7 + $0x140] ss:$8 sps:$4 sm:$0xff]  }
 0x152   :  { %479 = vmatprep.subr.bf16.mxu1 %v1203_v56 }
 0x154   :  { %1123 = vmatmul.mubr.msk.bf16.gmra.mrb[4].mxu1 %vm273_vm0, %v1477_v57 }
 0x155   :  { %480 = vmatpush1.bf16.msra.mxu1 %v1201_v58  ;;  %507 = vmatprep.mubr.bf16.mxu1 %v1376_v0 }
 0x156   :  { %481 = vmatprep.subr.bf16.mxu1 %v1206_v59 }
 0x159   :  { %482 = vmatpush1.bf16.msra.mxu1 %v1204_v60 }
 0x15a   :  { %483 = vmatprep.subr.bf16.mxu1 %v1209_v61 }
 0x15d   :  { %484 = vmatpush1.bf16.msra.mxu1 %v1207_v62 }
 0x15e   :  { %485 = vmatprep.subr.bf16.mxu1 %v1212_v63 }
 0x161   :  { %486 = vmatpush1.bf16.msra.mxu1 %v1210_v1 }
 0x162   :  { %487 = vmatprep.subr.bf16.mxu1 %v1215_v2 }
 0x165   :  { %488 = vmatpush1.bf16.msra.mxu1 %v1213_v3 }
 0x166   :  { %489 = vmatprep.subr.bf16.mxu1 %v1218_v4 }
 0x169   :  { %490 = vmatpush1.bf16.msra.mxu1 %v1216_v5 }
 0x21f   :  { %v1120_v6 = vpop.f32.mrb[0].mxu1 }
 0x220   :  { %v329_v8 = vadd.f32 %v1120_v6, %v222_v36  ;;  %v320_v9 = vpop.f32.mrb[1].mxu1 }
 0x221   :  { %v321_v10 = vadd.f32 %v320_v9, %v1455_v31  ;;  %v1121_v11 = vpop.f32.mrb[2].mxu1 }
 0x222   :  { %v360_v12 = vadd.f32 %v1041_v7, %v329_v8  ;;  %v332_v13 = vadd.f32 %v1121_v11, %v1459_v39  ;;  %v323_v14 = vpop.f32.mrb[3].mxu1 }
 0x223   :  { %v358_v15 = vadd.f32 %v1041_v7, %v321_v10  ;;  %v324_v16 = vadd.f32 %v323_v14, %v1457_v34  ;;  %v1236_v14 = vld [vmem:[#allocation7 + $0x154] ss:$8 sps:$4 sm:$0xff]  }
 0x224   :  { %v361_v17 = vadd.f32 %v1041_v7, %v332_v13  ;;  %v368_v19 = vmax.f32 %v360_v12, 0.0 }
 0x225   :  { %v359_v18 = vadd.f32 %v1041_v7, %v324_v16  ;;  %v366_v21 = vmax.f32 %v358_v15, 0.0  ;;  %v1234_v15 = vld [vmem:[#allocation7 + $0x150] ss:$8 sps:$4 sm:$0xff]   ;;  %v1239_v16 = vld [vmem:[#allocation7 + $0x164] ss:$8 sps:$4 sm:$0xff]  }
 0x226   :  { %v369_v20 = vmax.f32 %v361_v17, 0.0  ;;  %v1237_v17 = vld [vmem:[#allocation7 + $0x160] ss:$8 sps:$4 sm:$0xff]  }
 0x227   :  { %v367_v22 = vmax.f32 %v359_v18, 0.0  ;;  %v1124_v23 = vpop.f32.mrb[4].mxu1  ;;  %v1242_v18 = vld [vmem:[#allocation7 + $0x174] ss:$8 sps:$4 sm:$0xff]  }
 0x228   :  { %v345_v24 = vadd.f32 %v1124_v23, %v1465_v46  ;;  %v336_v25 = vpop.f32.mrb[5].mxu1  ;;  %v392_v26 = vpack.c.bf16 %v369_v20, %v368_v19  ;;  %v1224_v46 = vld [vmem:[#allocation7 + $0x114] ss:$8 sps:$4 sm:$0xff]   ;;  %v1240_v19 = vld [vmem:[#allocation7 + $0x170] ss:$8 sps:$4 sm:$0xff]  }
 0x229   :  { %v391_v27 = vpack.c.bf16 %v367_v22, %v366_v21  ;;  %v337_v28 = vadd.f32 %v336_v25, %v1461_v41  ;;  %v1125_v30 = vpop.f32.mrb[6].mxu1  ;;  %v1219_v41 = vld [vmem:[#allocation7 + $0x100] ss:$8 sps:$4 sm:$0xff]  }
 0x22a   :  { %v364_v31 = vadd.f32 %v1041_v7, %v345_v24  ;;  %v348_v32 = vadd.f32 %v1125_v30, %v1467_v49  ;;  %v339_v33 = vpop.f32.mrb[7].mxu1  ;;  %v1225_v49 = vld [vmem:[#allocation7 + $0x120] ss:$8 sps:$4 sm:$0xff]  }
 0x22b   :  { %v362_v34 = vadd.f32 %v1041_v7, %v337_v28  ;;  %v340_v35 = vadd.f32 %v339_v33, %v1463_v44  ;;  %508 = vmatmul.mubr.bf16.vlgmr.msra.gmra.mrb[8].mxu1 %v391_v27  ;;  %v1221_v44 = vld [vmem:[#allocation7 + $0x104] ss:$8 sps:$4 sm:$0xff]   ;;  %v1063_v21 = vld [vmem:[%s1577_s3 + $0x1] ss:$0 sm:$0xff] }
 0x22c   :  { %v365_v36 = vadd.f32 %v1041_v7, %v348_v32  ;;  %517 = vmatprep.mubr.bf16.mxu1 %v1376_v0  ;;  %v372_v38 = vmax.f32 %v364_v31, 0.0  ;;  %742 = vmatprep.subr.bf16.mxu1 %v1221_v44 }
 0x22d   :  { %v363_v37 = vadd.f32 %v1041_v7, %v340_v35  ;;  %v370_v40 = vmax.f32 %v362_v34, 0.0  ;;  %743 = vmatpush1.bf16.msra.mxu1 %v1219_v41 }
 0x22e   :  { %v373_v39 = vmax.f32 %v365_v36, 0.0  ;;  %744 = vmatprep.subr.bf16.mxu1 %v1224_v46 }
 0x22f   :  { %v371_v42 = vmax.f32 %v363_v37, 0.0 }
 0x230   :  { %v394_v43 = vpack.c.bf16 %v373_v39, %v372_v38 }
 0x231   :  { %v393_v45 = vpack.c.bf16 %v371_v42, %v370_v40  ;;  %745 = vmatpush1.bf16.msra.mxu1 %v1222_v47 }
 0x232   :  { %746 = vmatprep.subr.bf16.mxu1 %v1227_v48 }
 0x233   :  { %518 = vmatmul.mubr.bf16.gmra.mrb[12].mxu1 %v392_v26 }
 0x234   :  { %527 = vmatprep.mubr.bf16.mxu1 %v1376_v0 }
 0x235   :  { %747 = vmatpush1.bf16.msra.mxu1 %v1225_v49 }
 0x236   :  { %748 = vmatprep.subr.bf16.mxu1 %v1230_v50 }
 0x239   :  { %749 = vmatpush1.bf16.msra.mxu1 %v1228_v53 }
 0x23a   :  { %750 = vmatprep.subr.bf16.mxu1 %v1233_v54 }
 0x23b   :  { %528 = vmatmul.mubr.bf16.gmra.mrb[16].mxu1 %v393_v45 }
 0x23c   :  { %537 = vmatprep.mubr.bf16.mxu1 %v1376_v0 }
 0x23d   :  { %751 = vmatpush1.bf16.msra.mxu1 %v1231_v55 }
 0x23e   :  { %752 = vmatprep.subr.bf16.mxu1 %v1236_v14 }
 0x241   :  { %753 = vmatpush1.bf16.msra.mxu1 %v1234_v15 }
 0x242   :  { %754 = vmatprep.subr.bf16.mxu1 %v1239_v16  ;;  %v900_v16 = vlaneseq }
 0x243   :  { %538 = vmatmul.mubr.bf16.gmra.mrb[20].mxu1 %v394_v43 }
 0x244   :  { %774 = vmatprep.mubr.bf16.mxu1 %v1376_v0 }
 0x245   :  { %755 = vmatpush1.bf16.msra.mxu1 %v1237_v17  ;;  %v901_v17 = vand.u32 127, %v900_v16 }
 0x246   :  { %756 = vmatprep.subr.bf16.mxu1 %v1242_v18 }
 0x247   :  { %vm902_vm1 = vcmp.lt.s32.totalorder %v901_v17, 8 }
 0x249   :  { %757 = vmatpush1.bf16.msra.mxu1 %v1240_v19  ;;  %v1085_v19 = vld [vmem:[%s1577_s3 + $0x2] ss:$0 sm:$0xff]  ;;  %s1377_s3 = smov [#allocation8]  }
 0x24a   :  { %s1004_s8 = sshll.u32 %s1377_s3, 4  ;;  %s1005_s8 = int_to_ptr.vmem [resolvable:$true] %s1004_s8 }
 0x24b   :  { %s1341_s9 = scalar_lea.vmem %s1005_s8, 1024  ;;  %p1346_p11 = scmp.lt.s32.totalorder %s1005_s8, %s1005_s8 }
 0x24c   :  { %p1342_p10 = scmp.ne.s32.totalorder %s1005_s8, %s1341_s9  ;;  %p1347_p12 = scmp.lt.s32.totalorder %s1341_s9, %s1341_s9 }
 0x24e   :  { %p1348_p13 = por %p1347_p12, %p1346_p11 }
 0x250   :  { %p1349_p0 = pnand %p1348_p13, %p1342_p10 }
 0x2fe   :  { %v509_v56 = vpop.f32.mrb[8].mxu1 }
 0x2ff   :  { %v511_v58 = vpop.f32.mrb[9].mxu1 }
 0x300   :  { %v513_v59 = vpop.f32.mrb[10].mxu1 }
 0x301   :  { %v548_v60 = vpack.c.bf16 %v513_v59, %v509_v56  ;;  %v515_v61 = vpop.f32.mrb[11].mxu1 }
 0x303   :  { %1126 = vmatprep.subr.bf16.mxu0 %v548_v60 }
 0x304   :  { %1127 = vmatpush3.bf16.msra.mxu0 %v548_v60 }
 0x306   :  { %v519_v62 = vpop.f32.mrb[12].mxu1 }
 0x307   :  { %v521_v63 = vpop.f32.mrb[13].mxu1 }
 0x308   :  { %v523_v1 = vpop.f32.mrb[14].mxu1 }
 0x309   :  { %v549_v2 = vpack.c.bf16 %v523_v1, %v519_v62  ;;  %v525_v3 = vpop.f32.mrb[15].mxu1 }
 0x30b   :  { %1128 = vmatprep.subr.bf16.mxu0 %v549_v2 }
 0x30c   :  { %1129 = vmatpush3.bf16.msra.mxu0 %v549_v2 }
 0x30e   :  { %v529_v4 = vpop.f32.mrb[16].mxu1 }
 0x30f   :  { %v531_v5 = vpop.f32.mrb[17].mxu1 }
 0x310   :  { %v533_v6 = vpop.f32.mrb[18].mxu1 }
 0x311   :  { %v550_v7 = vpack.c.bf16 %v533_v6, %v529_v4  ;;  %v535_v8 = vpop.f32.mrb[19].mxu1 }
 0x313   :  { %1130 = vmatprep.subr.bf16.mxu0 %v550_v7 }
 0x314   :  { %1131 = vmatpush3.bf16.msra.mxu0 %v550_v7 }
 0x316   :  { %v539_v9 = vpop.f32.mrb[20].mxu1 }
 0x317   :  { %v541_v10 = vpop.f32.mrb[21].mxu1 }
 0x318   :  { %v543_v11 = vpop.f32.mrb[22].mxu1 }
 0x319   :  { %v551_v12 = vpack.c.bf16 %v543_v11, %v539_v9  ;;  %v545_v13 = vpop.f32.mrb[23].mxu1 }
 0x31b   :  { %1132 = vmatprep.subr.bf16.mxu0 %v551_v12 }
 0x31c   :  { %1133 = vmatpush3.bf16.msra.mxu0 %v551_v12 }
 0x31f   :  { %1135 = vmatmul.mubr.msk.bf16.vlgmr.msra.gmra.mrb[16].mxu0 %vm273_vm0, %v1469_v51 }
 0x320   :  { %1138 = vmatprep.mubr.msk.bf16.mxu0 %vm273_vm0, %v1471_v52 }
 0x327   :  { %1139 = vmatmul.mubr.msk.bf16.gmra.mrb[20].mxu0 %vm273_vm0, %v1477_v57 }
 0x328   :  { %1150 = vmatprep.mubr.msk.bf16.mxu0 %vm273_vm0, %v1449_v29 }
 0x3f2   :  { %v1136_v20 = vpop.f32.mrb[16].mxu0 }
 0x3f3   :  { %v595_v22 = vadd.f32 %v1136_v20, %v521_v63  ;;  %v586_v23 = vpop.f32.mrb[17].mxu0 }
 0x3f4   :  { %v587_v29 = vadd.f32 %v586_v23, %v511_v58  ;;  %v1137_v24 = vpop.f32.mrb[18].mxu0 }
 0x3f5   :  { %v627_v25 = vadd.f32 %v1063_v21, %v595_v22  ;;  %v598_v26 = vadd.f32 %v1137_v24, %v525_v3  ;;  %v589_v27 = vpop.f32.mrb[19].mxu0 }
 0x3f6   :  { %v625_v28 = vadd.f32 %v1063_v21, %v587_v29  ;;  %v590_v30 = vadd.f32 %v589_v27, %v515_v61 }
 0x3f7   :  { %v628_v31 = vadd.f32 %v1063_v21, %v598_v26  ;;  %v635_v33 = vmax.f32 %v627_v25, 0.0 }
 0x3f8   :  { %v626_v32 = vadd.f32 %v1063_v21, %v590_v30  ;;  %v633_v35 = vmax.f32 %v625_v28, 0.0 }
 0x3f9   :  { %v636_v34 = vmax.f32 %v628_v31, 0.0 }
 0x3fa   :  { %v634_v36 = vmax.f32 %v626_v32, 0.0  ;;  %v1140_v37 = vpop.f32.mrb[20].mxu0 }
 0x3fb   :  { %v611_v38 = vadd.f32 %v1140_v37, %v541_v10  ;;  %v602_v39 = vpop.f32.mrb[21].mxu0  ;;  %v659_v40 = vpack.c.bf16 %v636_v34, %v635_v33 }
 0x3fc   :  { %v658_v42 = vpack.c.bf16 %v634_v36, %v633_v35  ;;  %v603_v43 = vadd.f32 %v602_v39, %v531_v5  ;;  %v1141_v45 = vpop.f32.mrb[22].mxu0 }
 0x3fd   :  { %v631_v41 = vadd.f32 %v1063_v21, %v611_v38  ;;  %v614_v44 = vadd.f32 %v1141_v45, %v545_v13  ;;  %v605_v46 = vpop.f32.mrb[23].mxu0 }
 0x3fe   :  { %v629_v47 = vadd.f32 %v1063_v21, %v603_v43  ;;  %v606_v48 = vadd.f32 %v605_v46, %v535_v8  ;;  %775 = vmatmul.mubr.bf16.vlgmr.msra.gmra.mrb[24].mxu1 %v658_v42 }
 0x3ff   :  { %v632_v49 = vadd.f32 %v1063_v21, %v614_v44  ;;  %784 = vmatprep.mubr.bf16.mxu1 %v1376_v0  ;;  %v639_v53 = vmax.f32 %v631_v41, 0.0 }
 0x400   :  { %v630_v50 = vadd.f32 %v1063_v21, %v606_v48  ;;  %v637_v55 = vmax.f32 %v629_v47, 0.0 }
 0x401   :  { %v640_v54 = vmax.f32 %v632_v49, 0.0 }
 0x402   :  { %v638_v56 = vmax.f32 %v630_v50, 0.0 }
 0x403   :  { %v661_v58 = vpack.c.bf16 %v640_v54, %v639_v53 }
 0x404   :  { %v660_v59 = vpack.c.bf16 %v638_v56, %v637_v55 }
 0x406   :  { %785 = vmatmul.mubr.bf16.gmra.mrb[28].mxu1 %v659_v40 }
 0x407   :  { %794 = vmatprep.mubr.bf16.mxu1 %v1376_v0 }
 0x40e   :  { %795 = vmatmul.mubr.bf16.gmra.mrb[32].mxu1 %v660_v59 }
 0x40f   :  { %804 = vmatprep.mubr.bf16.mxu1 %v1376_v0 }
 0x416   :  { %805 = vmatmul.mubr.bf16.gmra.mrb[36].mxu1 %v661_v58 }
 0x4d1   :  { %v776_v60 = vpop.f32.mrb[24].mxu1 }
 0x4d2   :  { %v778_v61 = vpop.f32.mrb[25].mxu1 }
 0x4d3   :  { %v780_v62 = vpop.f32.mrb[26].mxu1 }
 0x4d4   :  { %v815_v63 = vpack.c.bf16 %v780_v62, %v776_v60  ;;  %v782_v1 = vpop.f32.mrb[27].mxu1 }
 0x4d6   :  { %1142 = vmatprep.subr.bf16.mxu0 %v815_v63 }
 0x4d7   :  { %1143 = vmatpush3.bf16.msra.mxu0 %v815_v63 }
 0x4d9   :  { %v786_v2 = vpop.f32.mrb[28].mxu1 }
 0x4da   :  { %v788_v3 = vpop.f32.mrb[29].mxu1 }
 0x4db   :  { %v790_v4 = vpop.f32.mrb[30].mxu1 }
 0x4dc   :  { %v816_v5 = vpack.c.bf16 %v790_v4, %v786_v2  ;;  %v792_v6 = vpop.f32.mrb[31].mxu1 }
 0x4de   :  { %1144 = vmatprep.subr.bf16.mxu0 %v816_v5 }
 0x4df   :  { %1145 = vmatpush3.bf16.msra.mxu0 %v816_v5 }
 0x4e1   :  { %v796_v7 = vpop.f32.mrb[32].mxu1 }
 0x4e2   :  { %v798_v8 = vpop.f32.mrb[33].mxu1 }
 0x4e3   :  { %v800_v9 = vpop.f32.mrb[34].mxu1 }
 0x4e4   :  { %v817_v10 = vpack.c.bf16 %v800_v9, %v796_v7  ;;  %v802_v0 = vpop.f32.mrb[35].mxu1 }
 0x4e6   :  { %1146 = vmatprep.subr.bf16.mxu0 %v817_v10 }
 0x4e7   :  { %1147 = vmatpush3.bf16.msra.mxu0 %v817_v10 }
 0x4e9   :  { %v806_v11 = vpop.f32.mrb[36].mxu1 }
 0x4ea   :  { %v808_v12 = vpop.f32.mrb[37].mxu1 }
 0x4eb   :  { %v810_v13 = vpop.f32.mrb[38].mxu1 }
 0x4ec   :  { %v818_v14 = vpack.c.bf16 %v810_v13, %v806_v11  ;;  %v812_v15 = vpop.f32.mrb[39].mxu1 }
 0x4ee   :  { %1148 = vmatprep.subr.bf16.mxu0 %v818_v14 }
 0x4ef   :  { %1149 = vmatpush3.bf16.msra.mxu0 %v818_v14 }
 0x4f2   :  { %1151 = vmatmul.mubr.msk.bf16.vlgmr.msra.gmra.mrb[24].mxu0 %vm273_vm0, %v1469_v51 }
 0x4f3   :  { %1154 = vmatprep.mubr.msk.bf16.mxu0 %vm273_vm0, %v1471_v52 }
 0x4fa   :  { %1155 = vmatmul.mubr.msk.bf16.gmra.mrb[28].mxu0 %vm273_vm0, %v1477_v57 }
 0x5c5   :  { %v1152_v18 = vpop.f32.mrb[24].mxu0 }
 0x5c6   :  { %v862_v20 = vadd.f32 %v1152_v18, %v788_v3  ;;  %v853_v21 = vpop.f32.mrb[25].mxu0 }
 0x5c7   :  { %v854_v22 = vadd.f32 %v853_v21, %v778_v61  ;;  %v1153_v23 = vpop.f32.mrb[26].mxu0 }
 0x5c8   :  { %v865_v29 = vadd.f32 %v1153_v23, %v792_v6  ;;  %v856_v51 = vpop.f32.mrb[27].mxu0  ;;  %v894_v24 = vadd.f32 %v1085_v19, %v862_v20 }
 0x5c9   :  { %v857_v25 = vadd.f32 %v856_v51, %v782_v1  ;;  %v892_v52 = vadd.f32 %v1085_v19, %v854_v22 }
 0x5ca   :  { %v905_v26 = vsel %vm902_vm1, %v894_v24, -1e+30  ;;  %v895_v57 = vadd.f32 %v1085_v19, %v865_v29 }
 0x5cb   :  { %915 = vmax.xlane.f32.xlu1 %v905_v26  ;;  %v903_v27 = vsel %vm902_vm1, %v892_v52, -1e+30  ;;  %v893_v28 = vadd.f32 %v1085_v19, %v857_v25 }
 0x5cc   :  { %911 = vmax.xlane.f32.xlu0 %v903_v27  ;;  %v906_v33 = vsel %vm902_vm1, %v895_v57, -1e+30 }
 0x5cd   :  { %v1156_v30 = vpop.f32.mrb[28].mxu0  ;;  %v904_v36 = vsel %vm902_vm1, %v893_v28, -1e+30 }
 0x5ce   :  { %v878_v31 = vadd.f32 %v1156_v30, %v808_v12  ;;  %v869_v32 = vpop.f32.mrb[29].mxu0 }
 0x5cf   :  { %v870_v34 = vadd.f32 %v869_v32, %v798_v8  ;;  %917 = vmax.xlane.f32.xlu1 %v906_v33  ;;  %v1157_v35 = vpop.f32.mrb[30].mxu0 }
 0x5d0   :  { %v881_v37 = vadd.f32 %v1157_v35, %v812_v15  ;;  %v872_v38 = vpop.f32.mrb[31].mxu0  ;;  %913 = vmax.xlane.f32.xlu0 %v904_v36  ;;  %v898_v45 = vadd.f32 %v1085_v19, %v878_v31 }
 0x5d1   :  { %v873_v39 = vadd.f32 %v872_v38, %v802_v0  ;;  %v896_v40 = vadd.f32 %v1085_v19, %v870_v34 }
 0x5d2   :  { %v899_v44 = vadd.f32 %v1085_v19, %v881_v37  ;;  %v909_v46 = vsel %vm902_vm1, %v898_v45, -1e+30 }
 0x5d3   :  { %v907_v42 = vsel %vm902_vm1, %v896_v40, -1e+30  ;;  %v897_v43 = vadd.f32 %v1085_v19, %v873_v39 }
 0x5d4   :  { %919 = vmax.xlane.f32.xlu0 %v907_v42  ;;  %v910_v47 = vsel %vm902_vm1, %v899_v44, -1e+30 }
 0x5d5   :  { %v908_v41 = vsel %vm902_vm1, %v897_v43, -1e+30 }
 0x5d6   :  { %921 = vmax.xlane.f32.xlu1 %v908_v41 }
 0x5d8   :  { %923 = vmax.xlane.f32.xlu0 %v909_v46 }
 0x5da   :  { %925 = vmax.xlane.f32.xlu1 %v910_v47 }
 0x658   :  { %v916_v48 = vpop.xlane.xlu1 %915 }
 0x659   :  { %v1527_v49 = vsub.f32 %v905_v26, %v916_v48  ;;  %v912_v50 = vpop.xlane.xlu0 %911 }
 0x65a   :  { %v1529_v53 = vsub.f32 %v903_v27, %v912_v50 }
 0x65b   :  { %v939_v54 = vmul.f32 1.442695, %v1527_v49 }
 0x65c   :  { %v935_v55 = vmul.f32 1.442695, %v1529_v53  ;;  %v918_v56 = vpop.xlane.xlu1 %917 }
 0x65d   :  { %1243 = vpow2.f32 %v939_v54  ;;  %v1533_v58 = vsub.f32 %v906_v33, %v918_v56  ;;  %v914_v59 = vpop.xlane.xlu0 %913 }
 0x65e   :  { %v1535_v60 = vsub.f32 %v904_v36, %v914_v59  ;;  %1245 = vpow2.f32 %v935_v55 }
 0x65f   :  { %v941_v61 = vmul.f32 1.442695, %v1533_v58 }
 0x660   :  { %v937_v62 = vmul.f32 1.442695, %v1535_v60 }
 0x661   :  { %1247 = vpow2.f32 %v941_v61  ;;  %v920_v63 = vpop.xlane.xlu0 %919 }
 0x662   :  { %v1539_v1 = vsub.f32 %v907_v42, %v920_v63  ;;  %1249 = vpow2.f32 %v937_v62 }
 0x663   :  { %v922_v2 = vpop.xlane.xlu1 %921 }
 0x664   :  { %v943_v3 = vmul.f32 1.442695, %v1539_v1  ;;  %v1542_v4 = vsub.f32 %v908_v41, %v922_v2 }
 0x665   :  { %v924_v5 = vpop.xlane.xlu0 %923 }
 0x666   :  { %1251 = vpow2.f32 %v943_v3  ;;  %v945_v6 = vmul.f32 1.442695, %v1542_v4  ;;  %v1545_v7 = vsub.f32 %v909_v46, %v924_v5 }
 0x667   :  { %v1244_v8 = vpop.eup %1243  ;;  %v926_v9 = vpop.xlane.xlu1 %925 }
 0x668   :  { %1253 = vpow2.f32 %v945_v6  ;;  %v947_v10 = vmul.f32 1.442695, %v1545_v7  ;;  %v1548_v0 = vsub.f32 %v910_v47, %v926_v9  ;;  %955 = vadd.xlane.f32.xlu0 %v1244_v8  ;;  %v1246_v11 = vpop.eup %1245 }
 0x66a   :  { %1255 = vpow2.f32 %v947_v10  ;;  %v949_v12 = vmul.f32 1.442695, %v1548_v0 }
 0x66b   :  { %v1248_v13 = vpop.eup %1247 }
 0x66c   :  { %1257 = vpow2.f32 %v949_v12  ;;  %951 = vadd.xlane.f32.xlu0 %v1246_v11  ;;  %957 = vadd.xlane.f32.xlu1 %v1248_v13  ;;  %v1250_v14 = vpop.eup %1249 }
 0x670   :  { %v1252_v15 = vpop.eup %1251  ;;  %953 = vadd.xlane.f32.xlu1 %v1250_v14 }
 0x671   :  { %959 = vadd.xlane.f32.xlu0 %v1252_v15 }
 0x672   :  { %v1254_v16 = vpop.eup %1253 }
 0x674   :  { %v1256_v17 = vpop.eup %1255  ;;  %961 = vadd.xlane.f32.xlu1 %v1254_v16 }
 0x675   :  { %963 = vadd.xlane.f32.xlu0 %v1256_v17 }
 0x676   :  { %v1258_v18 = vpop.eup %1257 }
 0x678   :  { %965 = vadd.xlane.f32.xlu1 %v1258_v18 }
 0x6f5   :  { %v956_v19 = vpop.xlane.xlu0 %955 }
 0x6f6   :  { %1259 = vlog2.f32 %v956_v19 }
 0x6f9   :  { %v952_v20 = vpop.xlane.xlu0 %951  ;;  %v958_v21 = vpop.xlane.xlu1 %957 }
 0x6fa   :  { %1261 = vlog2.f32 %v952_v20 }
 0x6fb   :  { %1263 = vlog2.f32 %v958_v21 }
 0x6fd   :  { %v954_v22 = vpop.xlane.xlu1 %953 }
 0x6fe   :  { %1265 = vlog2.f32 %v954_v22  ;;  %v960_v23 = vpop.xlane.xlu0 %959 }
 0x6ff   :  { %1267 = vlog2.f32 %v960_v23 }
 0x700   :  { %v1260_v29 = vpop.eup %1259 }
 0x701   :  { %v972_v51 = vmul.f32 0.6931472, %v1260_v29  ;;  %v962_v24 = vpop.xlane.xlu1 %961 }
 0x702   :  { %1269 = vlog2.f32 %v962_v24  ;;  %v964_v25 = vpop.xlane.xlu0 %963 }
 0x703   :  { %v985_v52 = vsub.f32 %v1527_v49, %v972_v51  ;;  %1271 = vlog2.f32 %v964_v25 }
 0x704   :  { %v1262_v26 = vpop.eup %1261 }
 0x705   :  { %v1264_v57 = vpop.eup %1263  ;;  %993 = vst [vmem:[#allocation8 + $0x10] sm:$0xff] %v985_v52  ;;  %v968_v27 = vmul.f32 0.6931472, %v1262_v26  ;;  %v966_v28 = vpop.xlane.xlu1 %965 }
 0x706   :  { %v974_v30 = vmul.f32 0.6931472, %v1264_v57  ;;  %1273 = vlog2.f32 %v966_v28 }
 0x707   :  { %v983_v31 = vsub.f32 %v1529_v53, %v968_v27 }
 0x708   :  { %v1266_v32 = vpop.eup %1265  ;;  %v986_v33 = vsub.f32 %v1533_v58, %v974_v30 }
 0x709   :  { %v1268_v34 = vpop.eup %1267  ;;  %991 = vst [vmem:[#allocation8] sm:$0xff] %v983_v31  ;;  %v970_v35 = vmul.f32 0.6931472, %v1266_v32 }
 0x70a   :  { %994 = vst [vmem:[#allocation8 + $0x18] sm:$0xff] %v986_v33  ;;  %v976_v36 = vmul.f32 0.6931472, %v1268_v34 }
 0x70b   :  { %v984_v37 = vsub.f32 %v1535_v60, %v970_v35 }
 0x70c   :  { %v1270_v38 = vpop.eup %1269  ;;  %v987_v39 = vsub.f32 %v1539_v1, %v976_v36 }
 0x70d   :  { %v1272_v40 = vpop.eup %1271  ;;  %992 = vst [vmem:[#allocation8 + $0x8] sm:$0xff] %v984_v37  ;;  %v978_v42 = vmul.f32 0.6931472, %v1270_v38 }
 0x70e   :  { %995 = vst [vmem:[#allocation8 + $0x20] sm:$0xff] %v987_v39  ;;  %v980_v43 = vmul.f32 0.6931472, %v1272_v40 }
 0x70f   :  { %v988_v45 = vsub.f32 %v1542_v4, %v978_v42 }
 0x710   :  { %v1274_v41 = vpop.eup %1273  ;;  %v989_v44 = vsub.f32 %v1545_v7, %v980_v43 }
 0x711   :  { %996 = vst [vmem:[#allocation8 + $0x28] sm:$0xff] %v988_v45  ;;  %v982_v46 = vmul.f32 0.6931472, %v1274_v41 }
 0x712   :  { %997 = vst [vmem:[#allocation8 + $0x30] sm:$0xff] %v989_v44 }
 0x713   :  { %v990_v47 = vsub.f32 %v1548_v0, %v982_v46 }
 0x715   :  { %998 = vst [vmem:[#allocation8 + $0x38] sm:$0xff] %v990_v47 }
 0x716   :  { %1352 = shalt.err (!%p1349_p0)
}
 0x717   :  { %s1353_s12 = scalar_lea.hbm %s1578_s4, 1024 }
 0x718   :  { %p1354_p1 = scmp.ne.s32.totalorder %s1578_s4, %s1353_s12  ;;  %p1357_p2 = scmp.lt.u32.totalorder %s1353_s12, %s1578_s4 }
 0x71a   :  { %p1359_p3 = pnand %p1357_p2, %p1354_p1 }
 0x71c   :  { %1362 = shalt.err (!%p1359_p3)
}
 0x71d   :  { %1010 = dma.vmem_to_hbm [thread:$0]  %s1005_s8, 1024, %s1578_s4, [#allocation4], %s1370_s25, %s1370_s25, %s1371_s26  }
 0x71e   :  { %1367 = dma.done.wait [#allocation4], 1024  }
 0x71f   :  { %1368 = vsyncadd [#allocation4], 4294966272 }
 0x720   :  { %1014 = vsyncpa [#allocation3], 1 }
 0x721   :  { %1015 = vsyncpa [#allocation6], 1 }
 0x722   :  { %1016 = vsyncpa [#allocation4], 1 }

</bundles_post_ra>
